<compile_context>
chip_gen: v7x
topology: tpu7x:2x2x1
jax: 0.10.0
libtpu: 0.0.40
codegen_flags: <defaults>
</compile_context>

<pallas_src>
import jax
import jax.numpy as jnp
import numpy as np
from jax.experimental import pallas as pl
from jax.experimental.pallas import tpu as pltpu

SIGMA_DATA = 0.5
P_MEAN = -1.2
P_STD = 1.2

_LANE = 128


def _round_up(v, m):
    return (v + m - 1) // m * m


def _vmem_budget():
    """(per-pipeline-buffer byte budget, vmem_limit_bytes override or None).

    Generation-aware: v7x (64 MiB VMEM/TC, 3.2 TB/s HBM) wants the largest
    per-step bytes to hide the ~0.35us/step pipeline overhead; v5e/v6e have
    128 MiB physical VMEM but v5e's scoped default is only 16 MiB, so we raise
    the limit explicitly instead of shrinking the tiles.
    """
    try:
        phys = int(getattr(pltpu.get_tpu_info(), "vmem_capacity_bytes", 0))
    except Exception:
        phys = 0
    if phys <= 0:
        # Unknown generation: stay under v5e's 16 MiB scoped default.
        return 2 * 1024 * 1024, None
    limit = min(phys // 2, 64 * 1024 * 1024)
    # ~4 MiB/buffer: 2(in) + 2(out) pipeline buffers + ~2 in-kernel tile
    # temporaries ~= 6-7 tiles ~= 28 MiB -> fits v7x's 32 MiB scoped default
    # and the explicitly raised limit on v5e/v6e.
    per_buf = max(64 * 1024, min(4 * 1024 * 1024, limit // 8))
    return per_buf, limit


def _choose_lane_tile(hw, n_rows, itemsize, budget_bytes):
    """Pick lane-tile T (multiple of 128) and padded HW.

    Prefers (a) T dividing HW so no wrapper pad / trailing slice is needed,
    (b) the largest T under the per-buffer byte budget, (c) >= 2 grid steps so
    the "parallel" lane-tile axis can be split across v7x's 2 TensorCores.
    """
    lane_budget = max(_LANE,
                      (budget_bytes // (n_rows * itemsize)) // _LANE * _LANE)
    if hw % _LANE == 0:
        divisors = [d for d in range(_LANE, hw + 1, _LANE) if hw % d == 0]
        fitting = [d for d in divisors if d <= lane_budget] or [divisors[0]]
        t = max(fitting)
        if hw // t == 1 and len(fitting) > 1:
            t = max(d for d in fitting if d < hw)   # keep >= 2 grid steps
        return t, hw
    # Ragged HW (not a multiple of 128): fall back to padding.
    # TODO(synk): replace the pad with a lane-masked store on the last tile.
    hw128 = _round_up(hw, _LANE)
    t = min(lane_budget, hw128)
    return t, _round_up(hw, t)


def _make_edm_kernel(n_rows, n_chan):
    """Kernel body: one (B*C, T) lane-dense tile per grid step.

    F = tanh(sum_s dw[:, s] * roll(x, +s rows) + add);  D = c_skip*x + c_out*F
    where the per-shift diagonal weights dw already contain c_in and zeros
    wherever a shift would cross a batch block, so the circular wrap of the
    sublane roll never contributes.
    """
    shifts = list(range(-(n_chan - 1), n_chan))   # 2C-1 block diagonals

    def kernel(x_ref, dw_ref, coef_ref, o_ref):
        x = x_ref[...].astype(jnp.float32)        # (R, T), full sublane density
        dw = dw_ref[...]                          # (R, 2C-1)  resident in VMEM
        cf = coef_ref[...]                        # (R, 3)     resident in VMEM

        # centre diagonal (s == 0) + additive term (bias + temb*c_noise + ctx)
        f = cf[:, 2:3] + dw[:, n_chan - 1:n_chan] * x
        for k, s in enumerate(shifts):            # static unroll, 2C-2 rolls
            if s == 0:
                continue
            # rolled[r, :] == x[(r + s) % R, :]   (XLU sublane rotate; wrapped
            # rows carry zero weight in dw so they never contribute)
            rolled = pltpu.roll(x, shift=(-s) % n_rows, axis=0)
            f = f + dw[:, k:k + 1] * rolled       # VPU: 1 mul + 1 add / shift
        f = jnp.tanh(f)                           # EUP

        # D_x = c_skip * x + c_out * F_x   (dense rows, unmasked lane store)
        o_ref[...] = (cf[:, 0:1] * x + cf[:, 1:2] * f).astype(o_ref.dtype)

    return kernel


def edm_precond_forward(x, time, text_embed, text_mask, params, *,
                        sigma_data=SIGMA_DATA):
    """EDMPrecond.forward (noise_cond_aug=False path).

    x:           (B, C, H, W) float32   (NCHW, like PyTorch)
    time:        scalar or (B,) float32 (sigma; EDM's lognormal sample_time
                 guarantees sigma > 0 -- matches torch `sigma.log()` semantics)
    text_embed:  (B, S, D) float32
    text_mask:   (B, S)    (bool or {0,1})
    params:      dict with "w" (C,C), "bias" (C,1), "temb" (C,1), "wtxt" (C,D)
    """
    B, C, H, W = x.shape
    HW = H * W
    N = B * C

    time = jnp.asarray(time, jnp.float32)
    assert time.ndim <= 1, "time should be in shape of either [bs] or scalar"
    sigma = jnp.broadcast_to(time.reshape(-1), (B,))   # covers c_noise.repeat(bs)

    # ---- EDM coefficients (per batch; scalar work kept out of the kernel) ---
    sd2 = sigma_data * sigma_data
    denom = sigma * sigma + sd2
    inv_sqrt = 1.0 / jnp.sqrt(denom)
    c_skip = sd2 / denom
    c_out = sigma * sigma_data * inv_sqrt
    c_in = inv_sqrt
    c_noise = jnp.log(sigma) * 0.25       # sigma > 0 assumed (EDM sample_time)

    # ---- masked mean-pooled text conditioning -> per-(b,c) context ----------
    te = text_embed.astype(jnp.float32)
    tm = text_mask.astype(jnp.float32)
    pooled = jnp.sum(te * tm[..., None], axis=1) / (
        jnp.sum(tm, axis=1, keepdims=True) + 1e-6)               # (B, D)
    ctx = pooled @ params["wtxt"].astype(jnp.float32).T          # (B, C)

    bias = params["bias"].astype(jnp.float32)[:, 0]              # (C,)
    temb = params["temb"].astype(jnp.float32)[:, 0]              # (C,)
    add_bc = bias[None, :] + temb[None, :] * c_noise[:, None] + ctx   # (B, C)

    # per-row [c_skip, c_out, additive-term];  row r = b*C + c
    coefs = jnp.stack([jnp.repeat(c_skip, C),
                       jnp.repeat(c_out, C),
                       add_bc.reshape(N)], axis=1).astype(jnp.float32)  # (N, 3)

    # ---- (2C-1) block-diagonals of the channel mix, c_in folded in ----------
    #   dw[r, k] = W[c_r, c_r + s_k] * c_in[b_r]   if 0 <= c_r + s_k < C else 0
    rows = np.arange(N)
    b_idx, c_idx = rows // C, rows % C
    shifts = np.arange(-(C - 1), C)                              # (2C-1,)
    c_src = c_idx[:, None] + shifts[None, :]                     # (N, 2C-1)
    valid = ((c_src >= 0) & (c_src < C)).astype(np.float32)
    c_src = np.clip(c_src, 0, C - 1)
    w = params["w"].astype(jnp.float32)                          # (C, C)
    dw = (w[c_idx[:, None], c_src] * valid
          * c_in[b_idx][:, None]).astype(jnp.float32)            # (N, 2C-1)

    # ---- pack image as (B*C, HW): full sublane occupancy, HW on lanes -------
    itemsize = np.dtype(jnp.float32).itemsize
    per_buf_budget, vmem_limit = _vmem_budget()
    T, HW_pad = _choose_lane_tile(HW, N, itemsize, per_buf_budget)
    num_tiles = HW_pad // T

    x2 = x.reshape(N, HW).astype(jnp.float32)        # contiguous reshape, free
    if HW_pad != HW:                                 # only the ragged-HW path
        x2 = jnp.pad(x2, ((0, 0), (0, HW_pad - HW)))

    cp_kwargs = dict(dimension_semantics=("parallel",))
    if vmem_limit is not None:
        cp_kwargs["vmem_limit_bytes"] = int(vmem_limit)

    out = pl.pallas_call(
        _make_edm_kernel(N, C),
        out_shape=jax.ShapeDtypeStruct((N, HW_pad), jnp.float32),
        grid=(num_tiles,),
        in_specs=[
            pl.BlockSpec((N, T), lambda t: (0, t)),          # x tile (lane-dense)
            pl.BlockSpec((N, 2 * C - 1), lambda t: (0, 0)),  # diagonals (resident)
            pl.BlockSpec((N, 3), lambda t: (0, 0)),          # coefs (resident)
        ],
        out_specs=pl.BlockSpec((N, T), lambda t: (0, t)),
        compiler_params=pltpu.CompilerParams(**cp_kwargs),
    )(x2, dw, coefs)

    if HW_pad != HW:
        out = out[:, :HW]
    return out.reshape(B, C, H, W)


# ----------------------- pure-JAX reference (for checking) ------------------
def _unet_ref(x_in, c_noise, te, tm, params):
    # x_in: (B, C, HW), c_noise: (B,), te: (B, S, D), tm: (B, S, 1)
    f = jnp.einsum("ck,bkn->bcn", params["w"], x_in)
    pooled = jnp.sum(te * tm, axis=1) / (jnp.sum(tm, axis=1) + 1e-6)   # (B, D)
    ctx = jnp.einsum("cd,bd->bc", params["wtxt"], pooled)              # (B, C)
    f = (f + params["bias"][None] + params["temb"][None] * c_noise[:, None, None]
         + ctx[:, :, None])
    return jnp.tanh(f)


def edm_precond_ref(x, time, te, tm_2d, params, sigma_data=SIGMA_DATA):
    B, C, H, W = x.shape
    sigma = jnp.broadcast_to(jnp.asarray(time, jnp.float32).reshape(-1), (B,))
    c_skip = sigma_data ** 2 / (sigma ** 2 + sigma_data ** 2)
    c_out = sigma * sigma_data / jnp.sqrt(sigma ** 2 + sigma_data ** 2)
    c_in = 1.0 / jnp.sqrt(sigma_data ** 2 + sigma ** 2)
    c_noise = jnp.log(sigma) / 4.0
    x2 = x.reshape(B, C, H * W)
    tm = tm_2d.astype(jnp.float32)[..., None]
    F_x = _unet_ref(c_in[:, None, None] * x2, c_noise, te, tm, params)
    D_x = c_skip[:, None, None] * x2 + c_out[:, None, None] * F_x
    return D_x.reshape(B, C, H, W)


if __name__ == "__main__":
    B, C, H, W = 2, 4, 16, 16
    S, D = 8, 32

    key = jax.random.PRNGKey(0)
    kx, kt, ke, kw, kb, ktw, ktxt = jax.random.split(key, 7)

    x = jax.random.normal(kx, (B, C, H, W), jnp.float32)
    # sigma ~ exp(N(p_mean, p_std)) as in EDM.sample_time  (strictly > 0)
    time = jnp.exp(jax.random.normal(kt, (B,), jnp.float32) * P_STD + P_MEAN)
    text_embed = 0.5 * jax.random.normal(ke, (B, S, D), jnp.float32)
    text_mask = jnp.array([[1, 1, 1, 1, 1, 1, 0, 0],
                           [1, 1, 1, 1, 1, 1, 1, 1]], jnp.float32)

    params = {
        "w":    0.2 * jax.random.normal(kw, (C, C), jnp.float32),
        "bias": 0.1 * jax.random.normal(kb, (C, 1), jnp.float32),
        "temb": 0.1 * jax.random.normal(ktw, (C, 1), jnp.float32),
        "wtxt": 0.1 * jax.random.normal(ktxt, (C, D), jnp.float32),
    }

    out = edm_precond_forward(x, time, text_embed, text_mask, params)
    out = jax.block_until_ready(out)

    ref = edm_precond_ref(x, time, text_embed, text_mask, params)
    np.testing.assert_allclose(np.asarray(out), np.asarray(ref),
                               rtol=1e-4, atol=1e-4)
    print("KERNEL_OK")
</pallas_src>

<mosaic_0001>
module attributes {stable_mosaic.version = 11 : i64} {
  func.func @kernel(%arg0: i32, %arg1: memref<8x128xf32, #tpu.memory_space<vmem>>, %arg2: memref<8x7xf32, #tpu.memory_space<vmem>>, %arg3: memref<8x3xf32, #tpu.memory_space<vmem>>, %arg4: memref<8x128xf32, #tpu.memory_space<vmem>>) attributes {dimension_semantics = [#tpu.dimension_semantics<parallel>], iteration_bounds = array<i64: 2>, scalar_prefetch = 0 : i64, scratch_operands = 0 : i64, tpu.core_type = #tpu.core_type<tc>, window_params = [{transform_indices = @transform_0, window_bounds = array<i64: 8, 128>}, {pipeline_mode = #tpu.pipeline_mode<synchronous>, transform_indices = @transform_1, window_bounds = array<i64: 8, 7>}, {pipeline_mode = #tpu.pipeline_mode<synchronous>, transform_indices = @transform_2, window_bounds = array<i64: 8, 3>}, {transform_indices = @transform_3, window_bounds = array<i64: 8, 128>}]} {
    %c0 = arith.constant 0 : index
    %c0_0 = arith.constant 0 : index
    %0 = vector.load %arg1[%c0, %c0_0] : memref<8x128xf32, #tpu.memory_space<vmem>>, vector<8x128xf32>
    %c0_1 = arith.constant 0 : index
    %c0_2 = arith.constant 0 : index
    %1 = vector.load %arg2[%c0_1, %c0_2] : memref<8x7xf32, #tpu.memory_space<vmem>>, vector<8x7xf32>
    %c0_3 = arith.constant 0 : index
    %c0_4 = arith.constant 0 : index
    %2 = vector.load %arg3[%c0_3, %c0_4] : memref<8x3xf32, #tpu.memory_space<vmem>>, vector<8x3xf32>
    %3 = vector.extract_strided_slice %2 {offsets = [0, 2], sizes = [8, 1], strides = [1, 1]} : vector<8x3xf32> to vector<8x1xf32>
    %4 = vector.extract_strided_slice %1 {offsets = [0, 3], sizes = [8, 1], strides = [1, 1]} : vector<8x7xf32> to vector<8x1xf32>
    %5 = vector.broadcast %4 : vector<8x1xf32> to vector<8x128xf32>
    %6 = arith.mulf %5, %0 : vector<8x128xf32>
    %7 = vector.broadcast %3 : vector<8x1xf32> to vector<8x128xf32>
    %8 = arith.addf %7, %6 : vector<8x128xf32>
    %c3_i32 = arith.constant 3 : i32
    %9 = tpu.dynamic_rotate %0 by %c3_i32 dim 0 : vector<8x128xf32>, i32 -> vector<8x128xf32>
    %10 = vector.extract_strided_slice %1 {offsets = [0, 0], sizes = [8, 1], strides = [1, 1]} : vector<8x7xf32> to vector<8x1xf32>
    %11 = vector.broadcast %10 : vector<8x1xf32> to vector<8x128xf32>
    %12 = arith.mulf %11, %9 : vector<8x128xf32>
    %13 = arith.addf %8, %12 : vector<8x128xf32>
    %c2_i32 = arith.constant 2 : i32
    %14 = tpu.dynamic_rotate %0 by %c2_i32 dim 0 : vector<8x128xf32>, i32 -> vector<8x128xf32>
    %15 = vector.extract_strided_slice %1 {offsets = [0, 1], sizes = [8, 1], strides = [1, 1]} : vector<8x7xf32> to vector<8x1xf32>
    %16 = vector.broadcast %15 : vector<8x1xf32> to vector<8x128xf32>
    %17 = arith.mulf %16, %14 : vector<8x128xf32>
    %18 = arith.addf %13, %17 : vector<8x128xf32>
    %c1_i32 = arith.constant 1 : i32
    %19 = tpu.dynamic_rotate %0 by %c1_i32 dim 0 : vector<8x128xf32>, i32 -> vector<8x128xf32>
    %20 = vector.extract_strided_slice %1 {offsets = [0, 2], sizes = [8, 1], strides = [1, 1]} : vector<8x7xf32> to vector<8x1xf32>
    %21 = vector.broadcast %20 : vector<8x1xf32> to vector<8x128xf32>
    %22 = arith.mulf %21, %19 : vector<8x128xf32>
    %23 = arith.addf %18, %22 : vector<8x128xf32>
    %c7_i32 = arith.constant 7 : i32
    %24 = tpu.dynamic_rotate %0 by %c7_i32 dim 0 : vector<8x128xf32>, i32 -> vector<8x128xf32>
    %25 = vector.extract_strided_slice %1 {offsets = [0, 4], sizes = [8, 1], strides = [1, 1]} : vector<8x7xf32> to vector<8x1xf32>
    %26 = vector.broadcast %25 : vector<8x1xf32> to vector<8x128xf32>
    %27 = arith.mulf %26, %24 : vector<8x128xf32>
    %28 = arith.addf %23, %27 : vector<8x128xf32>
    %c6_i32 = arith.constant 6 : i32
    %29 = tpu.dynamic_rotate %0 by %c6_i32 dim 0 : vector<8x128xf32>, i32 -> vector<8x128xf32>
    %30 = vector.extract_strided_slice %1 {offsets = [0, 5], sizes = [8, 1], strides = [1, 1]} : vector<8x7xf32> to vector<8x1xf32>
    %31 = vector.broadcast %30 : vector<8x1xf32> to vector<8x128xf32>
    %32 = arith.mulf %31, %29 : vector<8x128xf32>
    %33 = arith.addf %28, %32 : vector<8x128xf32>
    %c5_i32 = arith.constant 5 : i32
    %34 = tpu.dynamic_rotate %0 by %c5_i32 dim 0 : vector<8x128xf32>, i32 -> vector<8x128xf32>
    %35 = vector.extract_strided_slice %1 {offsets = [0, 6], sizes = [8, 1], strides = [1, 1]} : vector<8x7xf32> to vector<8x1xf32>
    %36 = vector.broadcast %35 : vector<8x1xf32> to vector<8x128xf32>
    %37 = arith.mulf %36, %34 : vector<8x128xf32>
    %38 = arith.addf %33, %37 : vector<8x128xf32>
    %39 = math.tanh %38 : vector<8x128xf32>
    %40 = vector.extract_strided_slice %2 {offsets = [0, 0], sizes = [8, 1], strides = [1, 1]} : vector<8x3xf32> to vector<8x1xf32>
    %41 = vector.broadcast %40 : vector<8x1xf32> to vector<8x128xf32>
    %42 = arith.mulf %41, %0 : vector<8x128xf32>
    %43 = vector.extract_strided_slice %2 {offsets = [0, 1], sizes = [8, 1], strides = [1, 1]} : vector<8x3xf32> to vector<8x1xf32>
    %44 = vector.broadcast %43 : vector<8x1xf32> to vector<8x128xf32>
    %45 = arith.mulf %44, %39 : vector<8x128xf32>
    %46 = arith.addf %42, %45 : vector<8x128xf32>
    %c0_5 = arith.constant 0 : index
    %c0_6 = arith.constant 0 : index
    %47 = vector.load %arg4[%c0_5, %c0_6] : memref<8x128xf32, #tpu.memory_space<vmem>>, vector<8x128xf32>
    tpu.vector_store %arg4[%c0_5, %c0_6], %46 {strides = array<i32>} : memref<8x128xf32, #tpu.memory_space<vmem>>, vector<8x128xf32>,
    return
  }
  func.func @transform_0(%arg0: i32) -> (i32, i32) {
    %c0_i32 = arith.constant 0 : i32
    %c0_i32_0 = arith.constant 0 : i32
    return %c0_i32, %arg0 : i32, i32
  }
  func.func @transform_1(%arg0: i32) -> (i32, i32) {
    %c0_i32 = arith.constant 0 : i32
    %c0_i32_0 = arith.constant 0 : i32
    %c0_i32_1 = arith.constant 0 : i32
    return %c0_i32, %c0_i32_0 : i32, i32
  }
  func.func @transform_2(%arg0: i32) -> (i32, i32) {
    %c0_i32 = arith.constant 0 : i32
    %c0_i32_0 = arith.constant 0 : i32
    %c0_i32_1 = arith.constant 0 : i32
    return %c0_i32, %c0_i32_0 : i32, i32
  }
  func.func @transform_3(%arg0: i32) -> (i32, i32) {
    %c0_i32 = arith.constant 0 : i32
    %c0_i32_0 = arith.constant 0 : i32
    return %c0_i32, %arg0 : i32, i32
  }
}

</mosaic_0001>

<bundles_post_ra>
// kernel: tpu_custom_call.1
= control target key start
LH: loop header
LB: loop body
LE: loop exit
PB: predicated region body
PF: predicated region fallthrough
CT: control target
= control target key end

     0   :  { %8 = vsyncpa [#allocation3], 0  ;;  %s719_s0 = inlined_call_operand.hbm [shape: f32[8,256], index: 0, kind: input, shape index: {}]   ;;  %s720_s1 = inlined_call_operand.vmem [shape: f32[8,7], index: 1, kind: input, shape index: {}]   ;;  %s721_s2 = inlined_call_operand.vmem [shape: f32[8,3], index: 2, kind: input, shape index: {}]   ;;  %s722_s3 = inlined_call_operand.hbm [shape: f32[8,256], index: 3, kind: output, shape index: {}]  }
   0x1   :  { %10 = vsyncpa [#allocation3 + $0x1], 0 }
   0x2   :  { %11 = vsyncpa [#allocation4], 0 }
   0x3   :  { %13 = vsyncpa [#allocation4 + $0x1], 0  ;;  %s545_s12 = smov 0   ;;  %s547_s13 = smov 0  }
   0x4   :  { %s549_s14 = smov 0   ;;  %s551_s15 = smov 0  }
   0x5 LB: > { %s566_s16 = sadd.s32 4294967295, %s514_s15   ;;  %s340_s17 = sadd.s32 4294967294, %s514_s15   ;;  %s514_s15 = sphi %s551_s15, %s737_s15   ;;  %s510_s14 = sphi %s549_s14, %s736_s14   ;;  %s506_s13 = sphi %s547_s13, %s735_s13   ;;  %s502_s12 = sphi %s545_s12, %s734_s12  }
   0x6   : > { %s570_s18 = sadd.s32 1, %s514_s15   ;;  %s26_s19 = sadd.s32 1, %s510_s14 }
   0x7   : > { %s23_s20 = ssub.s32 %s514_s15, %s570_s18  ;;  %p33_p0 = scmp.ne.s32.totalorder %s510_s14, %s506_s13 }
   0x8   : > { %p24_p1 = scmp.eq.s32.totalorder %s23_s20, 0  ;;  %p34_p2 = scmp.eq.s32.totalorder %s514_s15, 0 }
   0x9   : > { %p39_p3 = scmp.ne.s32.totalorder %s506_s13, %s502_s12  ;;  %p40_p4 = scmp.eq.s32.totalorder %s566_s16, 0 }
   0xa   : > { %s582_s21 = scalar_select %p24_p1, %s510_s14, %s26_s19  }
   0xb   : > { %p584_p5 = por %p34_p2, %p33_p0  ;;  %p588_p6 = por %p40_p4, %p39_p3 }
   0xc   : > { %p105_p7 = scmp.eq.s32.totalorder %s566_s16, 1  ;;  %p111_p8 = scmp.eq.s32.totalorder %s340_s17, 1 }
   0xd   : > { %p364_p10 = scmp.lt.s32.totalorder %s514_s15, 2  ;;  %s137_s26 = sand.u32 1, %s510_s14  }
   0xe   : > { %p595_p11 = por %p105_p7, %p33_p0  ;;  %p599_p12 = por %p111_p8, %p39_p3 }
   0xf   : > { %s344_s27 = sshll.u32 %s514_s15, 7  ;;  %s343_s28 = sshll.u32 %s137_s26, 3 }
  0x10   : > { %s726_s24 = scalar_select %p595_p11, 1, 0 }
  0x11   : > { %s727_s25 = scalar_select %p599_p12, 1, 0 }
  0x12   : > { %s608_s4 = scalar_lea.hbm %s719_s0, %s344_s27  ;;  %s141_s5 = scalar_lea.vmem [#allocation2], %s343_s28 }
  0x13   : > { %s148_s6 = sshll.u32 %s141_s5, 4  ;;  %p612_p13 = pnand %p364_p10, %p584_p5  ;;  %s616_s6 = int_to_ptr.vmem [resolvable:$true] %s148_s6 }
  0x14   : > { %s138_s8 = scalar_lea.sflag [#allocation3], %s137_s26  ;;  %s418_s9 = scalar_lea.hbm %s608_s4, 128 }
  0x15   : > { %p419_p2 = scmp.ne.s32.totalorder %s608_s4, %s418_s9  ;;  %p420_p3 = pneg %p612_p13 }
  0x16   : > { %s423_s17 = scalar_lea.hbm %s719_s0, 256  ;;  %p424_p5 = scmp.lt.u32.totalorder %s608_s4, %s719_s0 }
  0x17   : > { %p421_p4 = pnand %p420_p3, %p419_p2  ;;  %p425_p8 = scmp.lt.u32.totalorder %s423_s17, %s418_s9 }
  0x18   : > { %p427_p9 = scmp.lt.u32.totalorder %s418_s9, %s608_s4 }
  0x19   : > { %p422_p7 = pneg %p421_p4  ;;  %p426_p10 = por %p425_p8, %p424_p5 }
  0x1b   : > { %p428_p0 = por %p427_p9, %p426_p10 }
  0x1d   : > { %p429_p1 = pnand %p428_p0, %p422_p7 }
  0x1f   : > { %432 = shalt.err (!%p429_p1)
}
  0x20   : > { %s433_s22 = scalar_lea.vmem %s616_s6, 128  ;;  %s516_s26 = smov [#allocation2]  }
  0x21   : > { %p434_p2 = scmp.ne.s32.totalorder %s616_s6, %s433_s22  ;;  %s438_s27 = sshll.u32 %s516_s26, 4  ;;  %s439_s27 = int_to_ptr.vmem [resolvable:$false] %s438_s27 }
  0x22   : > { %s440_s28 = scalar_lea.vmem %s439_s27, 256  ;;  %p441_p11 = scmp.lt.s32.totalorder %s616_s6, %s439_s27 }
  0x23   : > { %p436_p4 = pnand %p434_p2, %p420_p3  ;;  %p442_p5 = scmp.lt.s32.totalorder %s440_s28, %s433_s22 }
  0x25   : > { %p437_p12 = pneg %p436_p4  ;;  %p443_p8 = por %p442_p5, %p441_p11 }
  0x27   : > { %p444_p9 = pnand %p443_p8, %p437_p12 }
  0x29   : > { %447 = shalt.err (!%p444_p9)
}
  0x2a   : > { %359 = dma.hbm_to_vmem [thread:$0]  (!%p612_p13), %s608_s4, 128, %s616_s6, %s138_s8  }
  0x2b   : > { %p729_p0 = scmp.lt.s32.totalorder %s514_s15, 3  ;;  %p730_p1 = scmp.ge.s32.totalorder %s514_s15, 1 }
  0x2d   : > { %p154_p3 = pnand %p730_p1, %p729_p0 }
  0x2e   : > { %s650_s29 = sand.u32 (!%p154_p3), 1, %s506_s13  }
  0x2f   : > { %157 = sbr.rel (%p154_p3) target bundleno = 238 (0xee), region = 32  ;;  %s346_s30 = sshll.u32 (!%p154_p3), %s650_s29, 3 }
  0x30   : > { %s160_s5 = scalar_lea.sflag (!%p154_p3), [#allocation3], %s650_s29  ;;  %s656_s7 = scalar_lea.vmem (!%p154_p3), [#allocation2], %s346_s30 }
  0x36   : > { %493 = dma.done.wait (%p588_p6), %s160_s5, 128  }
  0x37   : > { %495 = vsyncadd (%p588_p6), %s160_s5, 4294967168  ;;  %v517_v0 = vmov 0   ;;  %v518_v1 = vmov 3   ;;  %v187_v2 = vld [vmem:[%s720_s1] sm:$0xff]  ;;  %v519_v4 = vmov 1   ;;  %v520_v5 = vmov 2  }
  0x38   : > { %407 = vset.pattern.permute.xlu1 %v517_v0  ;;  %405 = vset.pattern.permute.xlu0 %v518_v1  ;;  %v188_v3 = vld [vmem:[%s721_s2] sm:$0xff]  ;;  %v521_v6 = vmov 4   ;;  %v522_v7 = vmov 5   ;;  %v523_v8 = vmov 6   ;;  %s349_s23 = sshll.u32 %s566_s16, 7  ;;  %s185_s10 = scalar_lea.vmem [#allocation5], %s346_s30 }
  0x39   : > { %203 = vperm.xlu1 %407, %v187_v2   ;;  %191 = vperm.xlu0 %405, %v187_v2   ;;  %v186_v9 = vld [vmem:[%s656_s7] sm:$0xff]  ;;  %s270_s11 = sshll.u32 %s185_s10, 4  ;;  %s675_s20 = scalar_lea.hbm %s722_s3, %s349_s23  ;;  %s677_s11 = int_to_ptr.vmem [resolvable:$true] %s270_s11 }
  0x3a   : > { %v201_v12 = vrot.slane %v186_v9, 5  ;;  %v208_v14 = vrot.slane %v186_v9, 6  ;;  %v215_v19 = vrot.slane %v186_v9, 7  ;;  %v222_v22 = vrot.slane %v186_v9, 1  ;;  %s257_s22 = scalar_lea.sflag [#allocation4], %s650_s29  ;;  %s448_s26 = scalar_lea.vmem %s677_s11, 128 }
  0x3b   : > { %v229_v29 = vrot.slane %v186_v9, 2  ;;  %v236_v33 = vrot.slane %v186_v9, 3  ;;  %p449_p6 = scmp.ne.s32.totalorder %s677_s11, %s448_s26  ;;  %p731_p11 = scmp.ne.s32.totalorder %s726_s24, 0 }
  0x3c   : > { %s524_s16 = smov [#allocation5]  }
  0x3d   : > { %408 = vset.pattern.permute.xlu1 %v519_v4  ;;  %406 = vset.pattern.permute.xlu0 %v520_v5  ;;  %p450_p12 = pnand %p449_p6, %p731_p11  ;;  %s452_s27 = sshll.u32 %s524_s16, 4  ;;  %s453_s27 = int_to_ptr.vmem [resolvable:$false] %s452_s27 }
  0x3e   : > { %210 = vperm.xlu1 %408, %v187_v2   ;;  %197 = vperm.xlu0 %406, %v188_v3   ;;  %s454_s28 = scalar_lea.vmem %s453_s27, 256  ;;  %p455_p7 = scmp.lt.s32.totalorder %s677_s11, %s453_s27 }
  0x3f   : > { %p451_p13 = pneg %p450_p12  ;;  %p456_p10 = scmp.lt.s32.totalorder %s454_s28, %s448_s26 }
  0x41   : > { %p457_p2 = por %p456_p10, %p455_p7 }
  0x42   : > { %409 = vset.pattern.permute.xlu1 %v520_v5  ;;  %410 = vset.pattern.permute.xlu0 %v521_v6 }
  0x43   : > { %217 = vperm.xlu1 %409, %v187_v2   ;;  %224 = vperm.xlu0 %410, %v187_v2   ;;  %p458_p4 = pnand %p457_p2, %p451_p13 }
  0x47   : > { %411 = vset.pattern.permute.xlu1 %v522_v7  ;;  %413 = vset.pattern.permute.xlu0 %v517_v0 }
  0x48   : > { %231 = vperm.xlu1 %411, %v187_v2   ;;  %245 = vperm.xlu0 %413, %v188_v3  }
  0x4c   : > { %412 = vset.pattern.permute.xlu1 %v523_v8  ;;  %415 = vset.pattern.permute.xlu0 %v519_v4 }
  0x4d   : > { %238 = vperm.xlu1 %412, %v187_v2  }
  0x51   : > { %414 = vset.pattern.permute.xlu1 %v519_v4 }
  0x52   : > { %250 = vperm.xlu1 %414, %v188_v3  }
  0xb8   : > { %v204_v10 = vpop.permute.xlu1 %203  ;;  %v192_v11 = vpop.permute.xlu0 %191 }
  0xb9   : > { %v194_v13 = vmul.f32 %v192_v11, %v186_v9  ;;  %v206_v17 = vmul.f32 %v204_v10, %v201_v12 }
  0xbd   : > { %v211_v15 = vpop.permute.xlu1 %210  ;;  %v198_v16 = vpop.permute.xlu0 %197 }
  0xbe   : > { %v200_v18 = vadd.f32 %v198_v16, %v194_v13  ;;  %v213_v20 = vmul.f32 %v211_v15, %v208_v14 }
  0xc0   : > { %v207_v21 = vadd.f32 %v206_v17, %v200_v18 }
  0xc2   : > { %v218_v23 = vpop.permute.xlu1 %217  ;;  %v214_v24 = vadd.f32 %v213_v20, %v207_v21  ;;  %v225_v25 = vpop.permute.xlu0 %224 }
  0xc3   : > { %v220_v26 = vmul.f32 %v218_v23, %v215_v19  ;;  %v227_v28 = vmul.f32 %v225_v25, %v222_v22 }
  0xc5   : > { %v221_v27 = vadd.f32 %v220_v26, %v214_v24 }
  0xc7   : > { %v232_v30 = vpop.permute.xlu1 %231  ;;  %v228_v31 = vadd.f32 %v227_v28, %v221_v27  ;;  %v246_v38 = vpop.permute.xlu0 %245 }
  0xc8   : > { %v234_v32 = vmul.f32 %v232_v30, %v229_v29  ;;  %v248_v40 = vmul.f32 %v246_v38, %v186_v9 }
  0xca   : > { %v235_v35 = vadd.f32 %v234_v32, %v228_v31 }
  0xcc   : > { %v239_v34 = vpop.permute.xlu1 %238 }
  0xcd   : > { %v241_v36 = vmul.f32 %v239_v34, %v236_v33 }
  0xcf   : > { %v242_v37 = vadd.f32 %v241_v36, %v235_v35 }
  0xd1   : > { %416 = vtanh.f32 %v242_v37  ;;  %v251_v39 = vpop.permute.xlu1 %250 }
  0xdb   : > { %v417_v41 = vpop.eup %416 }
  0xdc   : > { %v253_v42 = vmul.f32 %v417_v41, %v251_v39 }
  0xde   : > { %v254_v43 = vadd.f32 %v253_v42, %v248_v40 }
  0xe0   : > { %255 = vst [vmem:[%s185_s10] sm:$0xff] %v254_v43 }
  0xe1   : > { %461 = shalt.err (!%p458_p4)
}
  0xe2   : > { %s462_s29 = scalar_lea.hbm %s675_s20, 128  ;;  %s466_s7 = scalar_lea.hbm %s722_s3, 256 }
  0xe3   : > { %p463_p5 = scmp.ne.s32.totalorder %s675_s20, %s462_s29  ;;  %p467_p0 = scmp.lt.u32.totalorder %s675_s20, %s722_s3 }
  0xe4   : > { %p468_p1 = scmp.lt.u32.totalorder %s466_s7, %s462_s29  ;;  %p470_p6 = scmp.lt.u32.totalorder %s462_s29, %s675_s20 }
  0xe5   : > { %p464_p8 = pnand %p463_p5, %p731_p11 }
  0xe6   : > { %p469_p3 = por %p468_p1, %p467_p0 }
  0xe7   : > { %p465_p9 = pneg %p464_p8 }
  0xe8   : > { %p471_p12 = por %p470_p6, %p469_p3 }
  0xea   : > { %p472_p13 = pnand %p471_p12, %p465_p9 }
  0xec   : > { %475 = shalt.err (!%p472_p13)
}
  0xed   : > { %354 = dma.vmem_to_hbm [thread:$0]  (%p731_p11), %s677_s11, 128, %s675_s20, %s257_s22  }
  0xee PF: > { %s282_s8 = sand.u32 1, %s502_s12   ;;  %p732_p7 = scmp.ne.s32.totalorder %s727_s25, 0 }
  0xef   : > { %p733_p10 = scmp.ge.s32.totalorder %s514_s15, 2  ;;  %s283_s9 = scalar_lea.sflag [#allocation4], %s282_s8 }
  0xf1   : > { %p361_p2 = pnand %p733_p10, %p732_p7 }
  0xf3   : > { %497 = dma.done.wait (!%p361_p2), %s283_s9, 128  }
  0xf4   : > { %499 = vsyncadd (!%p361_p2), %s283_s9, 4294967168  ;;  %p16_p4 = scmp.ge.s32.totalorder %s570_s18, 4   ;;  %s734_s12 = smov %s506_s13 }
  0xf5   : > { %s735_s13 = smov %s510_s14  ;;  %s736_s14 = smov %s582_s21 }
  0xf6   : > { %s737_s15 = smov %s570_s18  ;;  %18 = sbr.rel (!%p16_p4) target bundleno = 5 (0x5), region = 77 }
  0xfd   :  { %288 = vsyncpa [#allocation3], 1 }
  0xfe   :  { %290 = vsyncpa [#allocation3 + $0x1], 1 }
  0xff   :  { %291 = vsyncpa [#allocation4], 1 }
 0x100   :  { %293 = vsyncpa [#allocation4 + $0x1], 1 }

</bundles_post_ra>
